<compile_context>
chip_gen: v7x
topology: tpu7x:2x2x1
jax: 0.10.0
libtpu: 0.0.40
codegen_flags: <defaults>
</compile_context>

<pallas_src>
import jax
import jax.numpy as jnp
from jax.experimental import pallas as pl
from jax.experimental.pallas import tpu as pltpu


def _make_split_dma_kernel(s0: int, s1: int):
    """Kernel that splits an (N, S) HBM array into (N, s0) and (N, s1) HBM outputs."""

    def kernel(x_ref, out0_ref, out1_ref, sem):
        # x_ref:    (N, s0 + s1) in HBM (pl.ANY)
        # out0_ref: (N, s0)      in HBM (pl.ANY)
        # out1_ref: (N, s1)      in HBM (pl.ANY)
        cp0 = pltpu.make_async_copy(x_ref.at[:, pl.ds(0, s0)], out0_ref, sem.at[0])
        cp1 = pltpu.make_async_copy(x_ref.at[:, pl.ds(s0, s1)], out1_ref, sem.at[1])
        # Issue both DMAs before waiting so they overlap on the DMA engine.
        cp0.start()
        cp1.start()
        cp0.wait()
        cp1.wait()

    return kernel


def split_block(x: jax.Array, ratio: float):
    """Pallas equivalent of SplitBlock(ratio).forward(x) for NCHW input x."""
    n, c_total, h, w = x.shape
    # Match PyTorch's `int(x.size(1) * self.ratio)` (float truncation).
    c = int(c_total * ratio)

    # Degenerate split -> one side has zero channels; no kernel needed.
    if c <= 0 or c >= c_total:
        return x[:, :c, :, :], x[:, c:, :, :]

    c1 = c_total - c
    hw = h * w
    s0, s1 = c * hw, c1 * hw

    # Per-batch flat view: channel split == flat split at element offset c*h*w.
    # (Contiguous reshape — a bitcast, no data movement.)
    x2 = x.reshape(n, c_total * hw)
    itemsize = jnp.dtype(x.dtype).itemsize

    out0_flat, out1_flat = pl.pallas_call(
        _make_split_dma_kernel(s0, s1),
        out_shape=(
            jax.ShapeDtypeStruct((n, s0), x.dtype),
            jax.ShapeDtypeStruct((n, s1), x.dtype),
        ),
        in_specs=[pl.BlockSpec(memory_space=pl.ANY)],
        out_specs=(
            pl.BlockSpec(memory_space=pl.ANY),
            pl.BlockSpec(memory_space=pl.ANY),
        ),
        scratch_shapes=[pltpu.SemaphoreType.DMA((2,))],
        cost_estimate=pl.CostEstimate(
            flops=0,
            transcendentals=0,
            bytes_accessed=2 * n * c_total * hw * itemsize,
        ),
    )(x2)

    return out0_flat.reshape(n, c, h, w), out1_flat.reshape(n, c1, h, w)


if __name__ == "__main__":
    key = jax.random.PRNGKey(0)
    # NCHW, small shapes; ratio = 0.5 -> channels split 2 / 2
    x = jax.random.normal(key, (2, 4, 16, 16), dtype=jnp.float32)
    ratio = 0.5

    out0, out1 = split_block(x, ratio)
    jax.block_until_ready((out0, out1))

    # Reference check against plain slicing (bit-exact copy expected).
    c = int(x.shape[1] * ratio)
    ref0 = x[:, :c, :, :]
    ref1 = x[:, c:, :, :]
    assert out0.shape == ref0.shape and out1.shape == ref1.shape
    assert jnp.array_equal(out0, ref0) and jnp.array_equal(out1, ref1)

    # Uneven, non-sublane-aligned split (c=1 / c1=3): handled at element
    # granularity by the DMA, no masked stores involved.
    o0, o1 = split_block(x, 0.3)
    jax.block_until_ready((o0, o1))
    c2 = int(x.shape[1] * 0.3)
    assert jnp.array_equal(o0, x[:, :c2, :, :]) and jnp.array_equal(o1, x[:, c2:, :, :])

    # Degenerate split path (no kernel) for safety.
    e0, e1 = split_block(x, 0.0)
    jax.block_until_ready((e0, e1))
    assert e0.shape == (2, 0, 16, 16) and jnp.array_equal(e1, x)

    print("KERNEL_OK")
</pallas_src>

<mosaic_0001>
module attributes {stable_mosaic.version = 11 : i64} {
  func.func @kernel(%arg0: memref<2x1024xf32, #tpu.memory_space<any>>, %arg1: memref<2x512xf32, #tpu.memory_space<any>>, %arg2: memref<2x512xf32, #tpu.memory_space<any>>, %arg3: memref<2x!tpu.dma_semaphore, #tpu.memory_space<semaphore_mem>>) attributes {dimension_semantics = [], scalar_prefetch = 0 : i64, scratch_operands = 1 : i64, tpu.core_type = #tpu.core_type<tc>} {
    %c0_i32 = arith.constant 0 : i32
    %c0_i32_0 = arith.constant 0 : i32
    %c0_i32_1 = arith.constant 0 : i32
    %0 = tpu.memref_slice %arg0[%c0_i32_0, %c0_i32_1] : memref<2x1024xf32, #tpu.memory_space<any>> -> memref<2x512xf32, #tpu.memory_space<any>>
    %1 = tpu.memref_slice %arg3[%c0_i32] : memref<2x!tpu.dma_semaphore, #tpu.memory_space<semaphore_mem>> -> memref<1x!tpu.dma_semaphore, #tpu.memory_space<semaphore_mem>>
    %2 = tpu.memref_squeeze %1 : memref<1x!tpu.dma_semaphore, #tpu.memory_space<semaphore_mem>> -> memref<!tpu.dma_semaphore, #tpu.memory_space<semaphore_mem>>
    tpu.enqueue_dma source(%0 : memref<2x512xf32, #tpu.memory_space<any>>) target(%arg1 : memref<2x512xf32, #tpu.memory_space<any>>) target_semaphore(%2 : memref<!tpu.dma_semaphore, #tpu.memory_space<semaphore_mem>>)
    %c1_i32 = arith.constant 1 : i32
    %c0_i32_2 = arith.constant 0 : i32
    %c512_i32 = arith.constant 512 : i32
    %3 = tpu.memref_slice %arg0[%c0_i32_2, %c512_i32] : memref<2x1024xf32, #tpu.memory_space<any>> -> memref<2x512xf32, #tpu.memory_space<any>>
    %4 = tpu.memref_slice %arg3[%c1_i32] : memref<2x!tpu.dma_semaphore, #tpu.memory_space<semaphore_mem>> -> memref<1x!tpu.dma_semaphore, #tpu.memory_space<semaphore_mem>>
    %5 = tpu.memref_squeeze %4 : memref<1x!tpu.dma_semaphore, #tpu.memory_space<semaphore_mem>> -> memref<!tpu.dma_semaphore, #tpu.memory_space<semaphore_mem>>
    tpu.enqueue_dma source(%3 : memref<2x512xf32, #tpu.memory_space<any>>) target(%arg2 : memref<2x512xf32, #tpu.memory_space<any>>) target_semaphore(%5 : memref<!tpu.dma_semaphore, #tpu.memory_space<semaphore_mem>>)
    %c0_i32_3 = arith.constant 0 : i32
    %c0_i32_4 = arith.constant 0 : i32
    %c0_i32_5 = arith.constant 0 : i32
    %6 = tpu.memref_slice %arg0[%c0_i32_4, %c0_i32_5] : memref<2x1024xf32, #tpu.memory_space<any>> -> memref<2x512xf32, #tpu.memory_space<any>>
    %7 = tpu.memref_slice %arg3[%c0_i32_3] : memref<2x!tpu.dma_semaphore, #tpu.memory_space<semaphore_mem>> -> memref<1x!tpu.dma_semaphore, #tpu.memory_space<semaphore_mem>>
    %8 = tpu.memref_squeeze %7 : memref<1x!tpu.dma_semaphore, #tpu.memory_space<semaphore_mem>> -> memref<!tpu.dma_semaphore, #tpu.memory_space<semaphore_mem>>
    tpu.wait_dma2 semaphore(%8 : memref<!tpu.dma_semaphore, #tpu.memory_space<semaphore_mem>>) src(%6 : memref<2x512xf32, #tpu.memory_space<any>>) dst(%arg1 : memref<2x512xf32, #tpu.memory_space<any>>)
    %c1_i32_6 = arith.constant 1 : i32
    %c0_i32_7 = arith.constant 0 : i32
    %c512_i32_8 = arith.constant 512 : i32
    %9 = tpu.memref_slice %arg0[%c0_i32_7, %c512_i32_8] : memref<2x1024xf32, #tpu.memory_space<any>> -> memref<2x512xf32, #tpu.memory_space<any>>
    %10 = tpu.memref_slice %arg3[%c1_i32_6] : memref<2x!tpu.dma_semaphore, #tpu.memory_space<semaphore_mem>> -> memref<1x!tpu.dma_semaphore, #tpu.memory_space<semaphore_mem>>
    %11 = tpu.memref_squeeze %10 : memref<1x!tpu.dma_semaphore, #tpu.memory_space<semaphore_mem>> -> memref<!tpu.dma_semaphore, #tpu.memory_space<semaphore_mem>>
    tpu.wait_dma2 semaphore(%11 : memref<!tpu.dma_semaphore, #tpu.memory_space<semaphore_mem>>) src(%9 : memref<2x512xf32, #tpu.memory_space<any>>) dst(%arg2 : memref<2x512xf32, #tpu.memory_space<any>>)
    return
  }
}

</mosaic_0001>

<bundles_post_ra>
// kernel: tpu_custom_call.1
= control target key start
LH: loop header
LB: loop body
LE: loop exit
PB: predicated region body
PF: predicated region fallthrough
CT: control target
= control target key end

     0   :  { %s66_s12 = smov [#allocation2]   ;;  %s67_s13 = smov [#allocation3]   ;;  %s98_s0 = inlined_call_operand.hbm [shape: f32[2,1024], index: 0, kind: input, shape index: {}]   ;;  %s99_s1 = inlined_call_operand.hbm [shape: f32[2,512], index: 1, kind: output, shape index: {0}]   ;;  %s100_s2 = inlined_call_operand.hbm [shape: f32[2,512], index: 2, kind: output, shape index: {1}]  }
   0x1   :  { %s21_s11 = scalar_lea.hbm %s98_s0, 128  ;;  %s68_s14 = smov 0  }
   0x2   :  { %20 = dma.general %s98_s0, 128, %s99_s1, %s66_s12, %s67_s13, [#allocation4], %s68_s14, 0  }
   0x3   :  { %s69_s19 = smov [#allocation2 + $0x1]   ;;  %s70_s20 = smov [#allocation5]  }
   0x4   :  { %35 = dma.general %s21_s11, 128, %s100_s2, %s69_s19, %s70_s20, [#allocation6], %s68_s14, 0  }
   0x5   :  { %62 = dma.done.wait [#allocation2], 128 }
   0x6   :  { %63 = vsyncadd [#allocation2], 4294967168 }
   0x7   :  { %64 = dma.done.wait [#allocation2 + $0x1], 128 }
   0x8   :  { %65 = vsyncadd [#allocation2 + $0x1], 4294967168 }
   0x9   :  { %42 = vsyncmov [#allocation2] }
   0xc   :  { %s43_s23 = vpop.sfrf %42 }
   0xd   :  { %p55_p0 = scmp.ne.s32.totalorder %s43_s23, 0 }
   0xf   :  { %47 = shalt.err (%p55_p0)  }
  0x10   :  { %49 = vsyncmov [#allocation2 + $0x1] }
  0x13   :  { %s50_s24 = vpop.sfrf %49 }
  0x14   :  { %p56_p1 = scmp.ne.s32.totalorder %s50_s24, 0 }
  0x16   :  { %54 = shalt.err (%p56_p1)  }

</bundles_post_ra>
